<compile_context>
chip_gen: v6e
topology: v6e:2x2x1
jax: 0.10.0
libtpu: 0.0.40
codegen_flags: <defaults>
</compile_context>

<pallas_src>
import functools

import jax
import jax.numpy as jnp
from jax.experimental import pallas as pl
from jax.experimental.pallas import tpu as pltpu

EPS = 1e-5


# ---------------------------------------------------------------------------
# bilinear (align_corners=True) interpolation matrix
# ---------------------------------------------------------------------------
def _bilinear_matrix(in_size, out_size):
    if out_size == 1:
        src = jnp.zeros((1,), dtype=jnp.float32)
    else:
        src = jnp.arange(out_size, dtype=jnp.float32) * (in_size - 1) / (out_size - 1)
    i0 = jnp.clip(jnp.floor(src).astype(jnp.int32), 0, in_size - 1)
    i1 = jnp.clip(i0 + 1, 0, in_size - 1)
    frac = src - i0.astype(jnp.float32)
    rows = jnp.arange(out_size)
    m = jnp.zeros((out_size, in_size), dtype=jnp.float32)
    m = m.at[rows, i0].add(1.0 - frac)
    m = m.at[rows, i1].add(frac)
    return m


# ---------------------------------------------------------------------------
# fused kernel: one batch image per grid step
# ---------------------------------------------------------------------------
def _upblock_kernel(x_ref, k_ref, win_ref, bin_ref, wdn_ref, bdn_ref, o_ref, *, bp):
    # x:   (1, C, H*W)      pixels on lanes
    # k:   (H*W, Ho*Wo)     Kronecker bilinear-interpolation matrix
    # win: (bp+out_c, C)    [up_project (zero-padded to bp rows) ; BN-folded shortcut]
    # bin: (bp+out_c, 1)
    # wdn: (out_c, bp)      BN-folded down_project (zero-padded cols)
    # bdn: (out_c, 1)
    # o:   (1, out_c, Ho*Wo)
    x = x_ref[0]

    # merged up_project + shortcut 1x1, evaluated at LOW resolution (commutes with Up)
    z = jnp.dot(win_ref[...], x, preferred_element_type=jnp.float32) + bin_ref[...]

    # bilinear upsample of all bp+out_c channels in a single lane-dense matmul
    zu = jnp.dot(z.astype(k_ref.dtype), k_ref[...], preferred_element_type=jnp.float32)

    h = jnp.maximum(zu[:bp, :], 0.0)                              # ReLU (adapter branch)
    y = jnp.dot(wdn_ref[...], h.astype(wdn_ref.dtype),
                preferred_element_type=jnp.float32) + bdn_ref[...]
    o_ref[0] = (y + zu[bp:, :]).astype(o_ref.dtype)               # + shortcut (BN folded)


# ---------------------------------------------------------------------------
# host-side parameter folding / packing
# ---------------------------------------------------------------------------
def _fold_params(p):
    bneck, _ = p["wup"].shape
    out_c = p["wdn"].shape[0]

    s1 = p["bn1_gamma"] / jnp.sqrt(p["bn1_var"] + EPS)
    t1 = p["bn1_beta"] - p["bn1_mean"] * s1
    s2 = p["bn2_gamma"] / jnp.sqrt(p["bn2_var"] + EPS)
    t2 = p["bn2_beta"] - p["bn2_mean"] * s2

    wdn_f = p["wdn"] * s1[:, None]          # (out_c, bneck)
    bdn_f = p["bdn"] * s1 + t1
    wsc_f = p["wsc"] * s2[:, None]          # (out_c, in_c)
    bsc_f = p["bsc"] * s2 + t2

    bp = ((bneck + 7) // 8) * 8             # pad bottleneck to a sublane multiple
    pad = bp - bneck
    wup_p = jnp.pad(p["wup"], ((0, pad), (0, 0)))
    bup_p = jnp.pad(p["bup"], ((0, pad),))
    wdn_p = jnp.pad(wdn_f, ((0, 0), (0, pad)))

    w_in = jnp.concatenate([wup_p, wsc_f], axis=0)          # (bp+out_c, in_c)
    b_in = jnp.concatenate([bup_p, bsc_f], axis=0)[:, None]  # (bp+out_c, 1)
    return w_in, b_in, wdn_p, bdn_f[:, None], bp, out_c


# ---------------------------------------------------------------------------
# public wrapper: NCHW in -> NCHW out
# ---------------------------------------------------------------------------
def up_block(x_nchw, params, scale, dot_dtype=jnp.float32):
    n, c, h, w = x_nchw.shape
    ho, wo = h * scale, w * scale
    hw, p_out = h * w, ho * wo

    rh = _bilinear_matrix(h, ho)            # (Ho, H)
    rw = _bilinear_matrix(w, wo)            # (Wo, W)
    # K[h*W+w, o*Wo+p] = Rh[o,h] * Rw[p,w]  =>  x_flat @ K == flattened bilinear upsample
    k = jnp.einsum("oh,pw->hwop", rh, rw).reshape(hw, p_out)

    w_in, b_in, wdn_p, bdn_f, bp, out_c = _fold_params(params)
    x2 = x_nchw.reshape(n, c, hw).astype(dot_dtype)   # free reshape, no transpose

    const2 = lambda i: (0, 0)
    out = pl.pallas_call(
        functools.partial(_upblock_kernel, bp=bp),
        out_shape=jax.ShapeDtypeStruct((n, out_c, p_out), jnp.float32),
        grid=(n,),
        in_specs=[
            pl.BlockSpec((1, c, hw), lambda i: (i, 0, 0)),
            pl.BlockSpec((hw, p_out), const2),
            pl.BlockSpec((bp + out_c, c), const2),
            pl.BlockSpec((bp + out_c, 1), const2),
            pl.BlockSpec((out_c, bp), const2),
            pl.BlockSpec((out_c, 1), const2),
        ],
        out_specs=pl.BlockSpec((1, out_c, p_out), lambda i: (i, 0, 0)),
        compiler_params=pltpu.CompilerParams(
            dimension_semantics=("parallel",),
            vmem_limit_bytes=32 * 1024 * 1024,
        ),
    )(
        x2,
        k.astype(dot_dtype),
        w_in.astype(dot_dtype),
        b_in,
        wdn_p.astype(dot_dtype),
        bdn_f,
    )
    return out.reshape(n, out_c, ho, wo)    # free reshape back to NCHW


# ---------------------------------------------------------------------------
# deterministic parameter init (shapes follow AdapterLayer.__init__)
# ---------------------------------------------------------------------------
def init_params(key, in_c, out_c, bottleneck):
    ks = jax.random.split(key, 8)
    r = lambda k, shape: 0.1 * jax.random.normal(k, shape, jnp.float32)
    return dict(
        wup=r(ks[0], (bottleneck, in_c)), bup=r(ks[1], (bottleneck,)),
        wdn=r(ks[2], (out_c, bottleneck)), bdn=r(ks[3], (out_c,)),
        wsc=r(ks[4], (out_c, in_c)),      bsc=r(ks[5], (out_c,)),
        bn1_gamma=1.0 + 0.1 * jax.random.normal(ks[6], (out_c,), jnp.float32),
        bn1_beta=jnp.linspace(-0.1, 0.1, out_c, dtype=jnp.float32),
        bn1_mean=jnp.linspace(-0.2, 0.2, out_c, dtype=jnp.float32),
        bn1_var=jnp.linspace(0.5, 1.5, out_c, dtype=jnp.float32),
        bn2_gamma=1.0 + 0.1 * jax.random.normal(ks[7], (out_c,), jnp.float32),
        bn2_beta=jnp.linspace(0.1, -0.1, out_c, dtype=jnp.float32),
        bn2_mean=jnp.linspace(0.2, -0.2, out_c, dtype=jnp.float32),
        bn2_var=jnp.linspace(1.5, 0.5, out_c, dtype=jnp.float32),
    )


# ---------------------------------------------------------------------------
# pure-JAX reference (PyTorch op order: upsample -> convs -> BN)
# ---------------------------------------------------------------------------
def reference(x, p, scale):
    n, c, h, w = x.shape
    rh = _bilinear_matrix(h, h * scale)
    rw = _bilinear_matrix(w, w * scale)
    xu = jnp.einsum("oh,nchw,pw->ncop", rh, x.astype(jnp.float32), rw)

    def conv1x1(z, wgt, b):
        return jnp.einsum("nchw,oc->nohw", z, wgt) + b[None, :, None, None]

    def bn(z, g, bta, mn, vr):
        s = g / jnp.sqrt(vr + EPS)
        return z * s[None, :, None, None] + (bta - mn * s)[None, :, None, None]

    out = jnp.maximum(conv1x1(xu, p["wup"], p["bup"]), 0.0)
    out = conv1x1(out, p["wdn"], p["bdn"])
    out = bn(out, p["bn1_gamma"], p["bn1_beta"], p["bn1_mean"], p["bn1_var"])
    sc = bn(conv1x1(xu, p["wsc"], p["bsc"]),
            p["bn2_gamma"], p["bn2_beta"], p["bn2_mean"], p["bn2_var"])
    return out + sc


if __name__ == "__main__":
    key = jax.random.PRNGKey(0)
    k_x, k_p = jax.random.split(key)

    batch, in_c, out_c, bottleneck, scale = 2, 4, 8, 4, 2
    H = W = 16
    x = jax.random.normal(k_x, (batch, in_c, H, W), jnp.float32)
    params = init_params(k_p, in_c, out_c, bottleneck)

    y_ref = reference(x, params, scale)

    # f32 path: tight correctness check
    y = jax.block_until_ready(up_block(x, params, scale))
    assert y.shape == (batch, out_c, H * scale, W * scale), y.shape
    assert jnp.allclose(y, y_ref, atol=1e-4, rtol=1e-4), \
        float(jnp.max(jnp.abs(y - y_ref)))

    # bf16-operand / f32-accumulate fast path (v6e/v7x): looser tolerance
    y_bf16 = jax.block_until_ready(up_block(x, params, scale, dot_dtype=jnp.bfloat16))
    assert y_bf16.shape == (batch, out_c, H * scale, W * scale), y_bf16.shape
    assert jnp.allclose(y_bf16, y_ref, atol=5e-2, rtol=5e-2), \
        float(jnp.max(jnp.abs(y_bf16 - y_ref)))

    print("KERNEL_OK")
</pallas_src>

<mosaic_0001>
module attributes {stable_mosaic.version = 11 : i64} {
  func.func @_upblock_kernel(%arg0: i32, %arg1: memref<1x4x256xf32, #tpu.memory_space<vmem>>, %arg2: memref<256x1024xf32, #tpu.memory_space<vmem>>, %arg3: memref<16x4xf32, #tpu.memory_space<vmem>>, %arg4: memref<16x1xf32, #tpu.memory_space<vmem>>, %arg5: memref<8x8xf32, #tpu.memory_space<vmem>>, %arg6: memref<8x1xf32, #tpu.memory_space<vmem>>, %arg7: memref<1x8x1024xf32, #tpu.memory_space<vmem>>) attributes {dimension_semantics = [#tpu.dimension_semantics<parallel>], iteration_bounds = array<i64: 2>, scalar_prefetch = 0 : i64, scratch_operands = 0 : i64, tpu.core_type = #tpu.core_type<tc>, window_params = [{transform_indices = @transform_0, window_bounds = array<i64: 1, 4, 256>}, {pipeline_mode = #tpu.pipeline_mode<synchronous>, transform_indices = @transform_1, window_bounds = array<i64: 256, 1024>}, {pipeline_mode = #tpu.pipeline_mode<synchronous>, transform_indices = @transform_2, window_bounds = array<i64: 16, 4>}, {pipeline_mode = #tpu.pipeline_mode<synchronous>, transform_indices = @transform_3, window_bounds = array<i64: 16, 1>}, {pipeline_mode = #tpu.pipeline_mode<synchronous>, transform_indices = @transform_4, window_bounds = array<i64: 8, 8>}, {pipeline_mode = #tpu.pipeline_mode<synchronous>, transform_indices = @transform_5, window_bounds = array<i64: 8, 1>}, {transform_indices = @transform_6, window_bounds = array<i64: 1, 8, 1024>}]} {
    %c0 = arith.constant 0 : index
    %c0_0 = arith.constant 0 : index
    %c0_1 = arith.constant 0 : index
    %0 = vector.load %arg1[%c0, %c0_0, %c0_1] : memref<1x4x256xf32, #tpu.memory_space<vmem>>, vector<1x4x256xf32>
    %1 = vector.shape_cast %0 : vector<1x4x256xf32> to vector<4x256xf32>
    %c0_2 = arith.constant 0 : index
    %c0_3 = arith.constant 0 : index
    %2 = vector.load %arg3[%c0_2, %c0_3] : memref<16x4xf32, #tpu.memory_space<vmem>>, vector<16x4xf32>
    %cst = arith.constant dense<0.000000e+00> : vector<16x256xf32>
    %3 = tpu.matmul %2, %1, %cst {dimension_numbers = #tpu.dot_dimension_numbers<[1], [0], [0], [1], [0, 0, 1, 1], [], []>} : vector<16x4xf32>, vector<4x256xf32>, vector<16x256xf32> -> vector<16x256xf32>
    %c0_4 = arith.constant 0 : index
    %c0_5 = arith.constant 0 : index
    %4 = vector.load %arg4[%c0_4, %c0_5] : memref<16x1xf32, #tpu.memory_space<vmem>>, vector<16x1xf32>
    %5 = vector.broadcast %4 : vector<16x1xf32> to vector<16x256xf32>
    %6 = arith.addf %3, %5 : vector<16x256xf32>
    %c0_6 = arith.constant 0 : index
    %c0_7 = arith.constant 0 : index
    %7 = vector.load %arg2[%c0_6, %c0_7] : memref<256x1024xf32, #tpu.memory_space<vmem>>, vector<256x1024xf32>
    %cst_8 = arith.constant dense<0.000000e+00> : vector<16x1024xf32>
    %8 = tpu.matmul %6, %7, %cst_8 {dimension_numbers = #tpu.dot_dimension_numbers<[1], [0], [0], [1], [0, 0, 1, 1], [], []>} : vector<16x256xf32>, vector<256x1024xf32>, vector<16x1024xf32> -> vector<16x1024xf32>
    %9 = vector.extract_strided_slice %8 {offsets = [0, 0], sizes = [8, 1024], strides = [1, 1]} : vector<16x1024xf32> to vector<8x1024xf32>
    %cst_9 = arith.constant 0.000000e+00 : f32
    %10 = vector.broadcast %cst_9 : f32 to vector<8x1024xf32>
    %11 = arith.maximumf %9, %10 : vector<8x1024xf32>
    %c0_10 = arith.constant 0 : index
    %c0_11 = arith.constant 0 : index
    %12 = vector.load %arg5[%c0_10, %c0_11] : memref<8x8xf32, #tpu.memory_space<vmem>>, vector<8x8xf32>
    %cst_12 = arith.constant dense<0.000000e+00> : vector<8x1024xf32>
    %13 = tpu.matmul %12, %11, %cst_12 {dimension_numbers = #tpu.dot_dimension_numbers<[1], [0], [0], [1], [0, 0, 1, 1], [], []>} : vector<8x8xf32>, vector<8x1024xf32>, vector<8x1024xf32> -> vector<8x1024xf32>
    %c0_13 = arith.constant 0 : index
    %c0_14 = arith.constant 0 : index
    %14 = vector.load %arg6[%c0_13, %c0_14] : memref<8x1xf32, #tpu.memory_space<vmem>>, vector<8x1xf32>
    %15 = vector.broadcast %14 : vector<8x1xf32> to vector<8x1024xf32>
    %16 = arith.addf %13, %15 : vector<8x1024xf32>
    %17 = vector.extract_strided_slice %8 {offsets = [8, 0], sizes = [8, 1024], strides = [1, 1]} : vector<16x1024xf32> to vector<8x1024xf32>
    %18 = arith.addf %16, %17 : vector<8x1024xf32>
    %c0_15 = arith.constant 0 : index
    %c0_16 = arith.constant 0 : index
    %c0_17 = arith.constant 0 : index
    %19 = vector.load %arg7[%c0_15, %c0_16, %c0_17] : memref<1x8x1024xf32, #tpu.memory_space<vmem>>, vector<1x8x1024xf32>
    %20 = vector.shape_cast %19 : vector<1x8x1024xf32> to vector<8x1024xf32>
    %21 = vector.shape_cast %18 : vector<8x1024xf32> to vector<1x8x1024xf32>
    tpu.vector_store %arg7[%c0_15, %c0_16, %c0_17], %21 {strides = array<i32>} : memref<1x8x1024xf32, #tpu.memory_space<vmem>>, vector<1x8x1024xf32>,
    return
  }
  func.func @transform_0(%arg0: i32) -> (i32, i32, i32) {
    %c0_i32 = arith.constant 0 : i32
    %c0_i32_0 = arith.constant 0 : i32
    %c0_i32_1 = arith.constant 0 : i32
    return %arg0, %c0_i32, %c0_i32_0 : i32, i32, i32
  }
  func.func @transform_1(%arg0: i32) -> (i32, i32) {
    %c0_i32 = arith.constant 0 : i32
    %c0_i32_0 = arith.constant 0 : i32
    %c0_i32_1 = arith.constant 0 : i32
    return %c0_i32, %c0_i32_0 : i32, i32
  }
  func.func @transform_2(%arg0: i32) -> (i32, i32) {
    %c0_i32 = arith.constant 0 : i32
    %c0_i32_0 = arith.constant 0 : i32
    %c0_i32_1 = arith.constant 0 : i32
    return %c0_i32, %c0_i32_0 : i32, i32
  }
  func.func @transform_3(%arg0: i32) -> (i32, i32) {
    %c0_i32 = arith.constant 0 : i32
    %c0_i32_0 = arith.constant 0 : i32
    %c0_i32_1 = arith.constant 0 : i32
    return %c0_i32, %c0_i32_0 : i32, i32
  }
  func.func @transform_4(%arg0: i32) -> (i32, i32) {
    %c0_i32 = arith.constant 0 : i32
    %c0_i32_0 = arith.constant 0 : i32
    %c0_i32_1 = arith.constant 0 : i32
    return %c0_i32, %c0_i32_0 : i32, i32
  }
  func.func @transform_5(%arg0: i32) -> (i32, i32) {
    %c0_i32 = arith.constant 0 : i32
    %c0_i32_0 = arith.constant 0 : i32
    %c0_i32_1 = arith.constant 0 : i32
    return %c0_i32, %c0_i32_0 : i32, i32
  }
  func.func @transform_6(%arg0: i32) -> (i32, i32, i32) {
    %c0_i32 = arith.constant 0 : i32
    %c0_i32_0 = arith.constant 0 : i32
    %c0_i32_1 = arith.constant 0 : i32
    return %arg0, %c0_i32, %c0_i32_0 : i32, i32, i32
  }
}

</mosaic_0001>

<bundles_post_ra>
// kernel: tpu_custom_call.1
= control target key start
LH: loop header
LB: loop body
LE: loop exit
PB: predicated region body
PF: predicated region fallthrough
CT: control target
= control target key end

     0   :  { %11 = vsyncpa [#allocation3], 0  ;;  %s1717_s0 = inlined_call_operand.vmem [shape: f32[2,4,256], index: 0, kind: input, shape index: {}]   ;;  %s1718_s1 = inlined_call_operand.hbm [shape: f32[256,1024], index: 1, kind: input, shape index: {}]   ;;  %s1719_s2 = inlined_call_operand.vmem [shape: f32[16,4], index: 2, kind: input, shape index: {}]   ;;  %s1720_s3 = inlined_call_operand.vmem [shape: f32[16,1], index: 3, kind: input, shape index: {}]   ;;  %s1721_s4 = inlined_call_operand.vmem [shape: f32[8,8], index: 4, kind: input, shape index: {}]   ;;  %s1722_s5 = inlined_call_operand.vmem [shape: f32[8,1], index: 5, kind: input, shape index: {}]   ;;  %s1723_s6 = inlined_call_operand.hbm [shape: f32[2,8,1024], index: 6, kind: output, shape index: {}]  }
   0x1   :  { %12 = vsyncpa [#allocation4], 0 }
   0x2   :  { %14 = vsyncpa [#allocation4 + $0x1], 0  ;;  %s1554_s21 = smov 0   ;;  %s1556_s22 = smov 0  }
   0x3   :  { %s1558_s23 = smov 0   ;;  %s1560_s24 = smov 0  }
   0x4 LB: > { %s1575_s25 = sadd.s32 4294967295, %s1511_s24   ;;  %s1340_s26 = sadd.s32 4294967294, %s1511_s24   ;;  %s1511_s24 = sphi %s1560_s24, %s1731_s24   ;;  %s1507_s23 = sphi %s1558_s23, %s1730_s23   ;;  %s1503_s22 = sphi %s1556_s22, %s1729_s22   ;;  %s1499_s21 = sphi %s1554_s21, %s1728_s21  }
   0x5   : > { %s1579_s27 = sadd.s32 1, %s1511_s24   ;;  %s158_s28 = sadd.s32 1, %s1507_s23 }
   0x6   : > { %s155_s29 = ssub.s32 %s1511_s24, %s1579_s27  ;;  %p168_p0 = scmp.ne.s32.totalorder %s1507_s23, %s1503_s22 }
   0x7   : > { %p156_p1 = scmp.eq.s32.totalorder %s155_s29, 0  ;;  %p169_p2 = scmp.eq.s32.totalorder %s1575_s25, 1 }
   0x8   : > { %p174_p3 = scmp.ne.s32.totalorder %s1503_s22, %s1499_s21  ;;  %p175_p4 = scmp.eq.s32.totalorder %s1340_s26, 1 }
   0x9   : > { %s1590_s30 = scalar_select %p156_p1, %s1507_s23, %s158_s28  }
   0xa   : > { %p1592_p5 = por %p169_p2, %p168_p0  ;;  %p1596_p6 = por %p175_p4, %p174_p3 }
   0xb   : > { %p1341_p7 = scmp.ge.s32.totalorder %s1511_s24, 1  ;;  %p182_p8 = scmp.lt.s32.totalorder %s1511_s24, 3 }
   0xc   : > { %s1725_s8 = scalar_select %p1596_p6, 1, 0 }
   0xd   : > { %p1378_p9 = scmp.eq.s32.totalorder %s1575_s25, 0  ;;  %p1603_p10 = pnand %p1341_p7, %p182_p8 }
   0xe   : > { %s1513_s10 = smov [#allocation2]  }
   0xf   : > { %s194_s11 = sshll.u32 %s1513_s10, 4  ;;  %p1370_p11 = pneg %p1603_p10  ;;  %s195_s11 = int_to_ptr.vmem [resolvable:$true] %s194_s11 }
  0x10   : > { %s1432_s12 = scalar_lea.vmem %s195_s11, 32768  ;;  %p1440_p3 = scmp.lt.s32.totalorder %s195_s11, %s195_s11 }
  0x11   : > { %p1371_p12 = pnand %p1378_p9, %p1370_p11  ;;  %p1433_p0 = scmp.ne.s32.totalorder %s195_s11, %s1432_s12 }
  0x12   : > { %p1441_p4 = scmp.lt.s32.totalorder %s1432_s12, %s1432_s12 }
  0x13   : > { %p1423_p13 = pneg %p1371_p12 }
  0x14   : > { %p1442_p6 = por %p1441_p4, %p1440_p3 }
  0x15   : > { %p1435_p1 = pnand %p1433_p0, %p1423_p13 }
  0x17   : > { %p1436_p2 = pneg %p1435_p1 }
  0x19   : > { %p1443_p7 = pnand %p1442_p6, %p1436_p2 }
  0x1b   : > { %1446 = shalt.err (!%p1443_p7)
}
  0x1c   : > { %s1514_s13 = smov 1024   ;;  %s1515_s14 = smov 64  }
  0x1d   : > { %1373 = dma.hbm_to_vmem [thread:$0]  (!%p1371_p12), %s1718_s1, 32768, %s195_s11, [#allocation3], %s1514_s13, %s1514_s13, %s1515_s14  }
  0x1e   : > { %230 = sbr.rel (%p1603_p10) target bundleno = 723 (0x2d3), region = 44 }
  0x23   : > { %1490 = dma.done.wait (%p1378_p9), [#allocation3], 32768  }
  0x24   : > { %1492 = vsyncadd (%p1378_p9), [#allocation3], 4294934528  ;;  %p260_p8 = scmp.lt.s32.totalorder %s1575_s25, 1  ;;  %v1516_v0 = vmov 0.0   ;;  %v1517_v1 = vmov 0   ;;  %vm289_vm0 = vcmask 1043456  }
  0x25   : > { %358 = vmatprep.mubr.f32.mxu0 %v1516_v0  ;;  %1418 = vset.pattern.permute.xlu0 %v1517_v1  ;;  %v268_v4 = vld [vmem:[%s1720_s3] sm:$0xff]  ;;  %v492_v5 = vld [vmem:[#allocation2 + $0x3c8] sm:$0xff]  ;;  %vm282_vm1 = vcmask 31744   ;;  %v494_v7 = vld [vmem:[#allocation2 + $0x3d8] sm:$0xff]  ;;  %vm950_vm2 = vcmask 64512   ;;  %s257_s19 = sand.u32 1, %s1503_s22  }
  0x26   : > { %s261_s17 = scalar_select %p260_p8, %s1575_s25, 1  ;;  %1419 = vset.pattern.permute.xlu1 %v1517_v1  ;;  %v266_v6 = vld [vmem:[%s1719_s2] sm:$0xff]  ;;  %272 = vperm.xlu0 %1418, %v268_v4   ;;  %v269_v9 = vld [vmem:[%s1720_s3 + $0x8] sm:$0xff]  ;;  %v493_v11 = vld [vmem:[#allocation2 + $0x3d0] sm:$0xff] }
  0x27   : > { %627 = vmatprep.subr.mxu1 %v492_v5  ;;  %v491_v8 = vld [vmem:[#allocation2 + $0x3c0] sm:$0xff]  ;;  %v484_v10 = vld [vmem:[#allocation2 + $0x388] sm:$0xff]  ;;  %v486_v13 = vld [vmem:[#allocation2 + $0x398] sm:$0xff]  ;;  %s1346_s20 = sshll.u32 %s257_s19, 6  ;;  %s1363_s28 = sshll.u32 %s1575_s25, 10 }
  0x28   : > { %s1362_s18 = sshll.u32 %s261_s17, 3  ;;  %628 = vmatpush1.msra.mxu1 %v491_v8  ;;  %v483_v12 = vld [vmem:[#allocation2 + $0x380] sm:$0xff]  ;;  %v476_v14 = vld [vmem:[#allocation2 + $0x348] sm:$0xff]  ;;  %v485_v17 = vld [vmem:[#allocation2 + $0x390] sm:$0xff]  ;;  %s1680_s11 = scalar_lea.hbm %s1723_s6, %s1363_s28 }
  0x29   : > { %s264_s26 = scalar_lea.vmem %s1717_s0, %s1362_s18  ;;  %629 = vmatprep.subr.mxu1 %v484_v10  ;;  %v267_v15 = vld [vmem:[%s1719_s2 + $0x8] sm:$0xff]  ;;  %v475_v16 = vld [vmem:[#allocation2 + $0x340] sm:$0xff]  ;;  %v478_v19 = vld [vmem:[#allocation2 + $0x358] sm:$0xff]  ;;  %s1255_s25 = scalar_lea.sflag [#allocation4], %s257_s19 }
  0x2a   : > { %v265_v2 = vld [vmem:[%s264_s26] sm:$0xff]  ;;  %277 = vperm.xlu0 %1418, %v269_v9   ;;  %630 = vmatpush1.msra.mxu1 %v483_v12  ;;  %v468_v18 = vld [vmem:[#allocation2 + $0x308] sm:$0xff]  ;;  %v477_v21 = vld [vmem:[#allocation2 + $0x350] sm:$0xff]  ;;  %s259_s26 = scalar_lea.vmem [#allocation5], %s1346_s20  ;;  %s1518_s13 = smov [#allocation5]  }
  0x2b   : > { %v281_v3 = vcombine.high %v265_v2, %v265_v2  ;;  %631 = vmatprep.subr.mxu1 %v476_v14  ;;  %v467_v20 = vld [vmem:[#allocation2 + $0x300] sm:$0xff]  ;;  %v460_v22 = vld [vmem:[#allocation2 + $0x2c8] sm:$0xff]  ;;  %v470_v23 = vld [vmem:[#allocation2 + $0x318] sm:$0xff]  ;;  %s1269_s29 = sshll.u32 %s259_s26, 4  ;;  %s1451_s14 = sshll.u32 %s1518_s13, 4  ;;  %s1270_s29 = int_to_ptr.vmem [resolvable:$true] %s1269_s29  ;;  %s1452_s14 = int_to_ptr.vmem [resolvable:$false] %s1451_s14 }
  0x2c   : > { %632 = vmatpush1.msra.mxu1 %v475_v16  ;;  %v459_v24 = vld [vmem:[#allocation2 + $0x2c0] sm:$0xff]  ;;  %v469_v25 = vld [vmem:[#allocation2 + $0x310] sm:$0xff]  ;;  %v452_v26 = vld [vmem:[#allocation2 + $0x288] sm:$0xff]  ;;  %s1447_s12 = scalar_lea.vmem %s1270_s29, 1024  ;;  %s1453_s15 = scalar_lea.vmem %s1452_s14, 2048 }
  0x2d   : > { %1349 = vmatprep.subr.msk.mxu0 %vm289_vm0, %v281_v3  ;;  %633 = vmatprep.subr.mxu1 %v468_v18  ;;  %v462_v27 = vld [vmem:[#allocation2 + $0x2d8] sm:$0xff]  ;;  %v451_v28 = vld [vmem:[#allocation2 + $0x280] sm:$0xff]  ;;  %v461_v29 = vld [vmem:[#allocation2 + $0x2d0] sm:$0xff]  ;;  %p1448_p6 = scmp.ne.s32.totalorder %s1270_s29, %s1447_s12  ;;  %p1454_p11 = scmp.lt.s32.totalorder %s1270_s29, %s1452_s14 }
  0x2e   : > { %1350 = vmatpush1.msk.msra.mxu0 %vm289_vm0, %v265_v2  ;;  %634 = vmatpush1.msra.mxu1 %v467_v20  ;;  %v444_v30 = vld [vmem:[#allocation2 + $0x248] sm:$0xff]  ;;  %v454_v31 = vld [vmem:[#allocation2 + $0x298] sm:$0xff]  ;;  %v443_v32 = vld [vmem:[#allocation2 + $0x240] sm:$0xff]  ;;  %p1455_p12 = scmp.lt.s32.totalorder %s1453_s15, %s1447_s12 }
  0x2f   : > { %1351 = vmatmul.mubr.msk.f32.vlgmr.msra.gmra.mxu0 %vm282_vm1, %v266_v6  ;;  %704 = vmatprep.subr.mxu0 %v494_v7  ;;  %v453_v33 = vld [vmem:[#allocation2 + $0x290] sm:$0xff]  ;;  %v436_v34 = vld [vmem:[#allocation2 + $0x208] sm:$0xff]  ;;  %v446_v35 = vld [vmem:[#allocation2 + $0x258] sm:$0xff]  ;;  %p1449_p9 = pnand %p1448_p6, %p1592_p5 }
  0x30   : > { %364 = vmatprep.mubr.f32.mxu0 %v1516_v0  ;;  %705 = vmatpush1.msra.mxu0 %v493_v11  ;;  %v435_v36 = vld [vmem:[#allocation2 + $0x200] sm:$0xff]  ;;  %v445_v37 = vld [vmem:[#allocation2 + $0x250] sm:$0xff]  ;;  %v428_v38 = vld [vmem:[#allocation2 + $0x1c8] sm:$0xff]  ;;  %p1456_p13 = por %p1455_p12, %p1454_p11 }
  0x31   : > { %706 = vmatprep.subr.mxu0 %v486_v13  ;;  %635 = vmatprep.subr.mxu1 %v460_v22  ;;  %v438_v39 = vld [vmem:[#allocation2 + $0x218] sm:$0xff]  ;;  %v427_v40 = vld [vmem:[#allocation2 + $0x1c0] sm:$0xff]  ;;  %v437_v41 = vld [vmem:[#allocation2 + $0x210] sm:$0xff]  ;;  %p1450_p10 = pneg %p1449_p9 }
  0x32   : > { %707 = vmatpush1.msra.mxu0 %v485_v17  ;;  %636 = vmatpush1.msra.mxu1 %v459_v24  ;;  %v420_v42 = vld [vmem:[#allocation2 + $0x188] sm:$0xff]  ;;  %v430_v43 = vld [vmem:[#allocation2 + $0x1d8] sm:$0xff]  ;;  %v419_v44 = vld [vmem:[#allocation2 + $0x180] sm:$0xff] }
  0x33   : > { %1352 = vmatmul.mubr.msk.f32.gmra.mxu0 %vm282_vm1, %v267_v15  ;;  %708 = vmatprep.subr.mxu0 %v478_v19  ;;  %v429_v45 = vld [vmem:[#allocation2 + $0x1d0] sm:$0xff]  ;;  %v412_v46 = vld [vmem:[#allocation2 + $0x148] sm:$0xff]  ;;  %v422_v47 = vld [vmem:[#allocation2 + $0x198] sm:$0xff]  ;;  %p1457_p0 = pnand %p1456_p13, %p1450_p10 }
  0x34   : > { %709 = vmatpush1.msra.mxu0 %v477_v21  ;;  %637 = vmatprep.subr.mxu1 %v452_v26  ;;  %v411_v48 = vld [vmem:[#allocation2 + $0x140] sm:$0xff]  ;;  %v421_v49 = vld [vmem:[#allocation2 + $0x190] sm:$0xff]  ;;  %v404_v50 = vld [vmem:[#allocation2 + $0x108] sm:$0xff] }
  0x35   : > { %710 = vmatprep.subr.mxu0 %v470_v23  ;;  %638 = vmatpush1.msra.mxu1 %v451_v28  ;;  %v414_v51 = vld [vmem:[#allocation2 + $0x158] sm:$0xff]  ;;  %v403_v52 = vld [vmem:[#allocation2 + $0x100] sm:$0xff]  ;;  %v413_v53 = vld [vmem:[#allocation2 + $0x150] sm:$0xff] }
  0x36   : > { %711 = vmatpush1.msra.mxu0 %v469_v25  ;;  %639 = vmatprep.subr.mxu1 %v444_v30  ;;  %v396_v54 = vld [vmem:[#allocation2 + $0xc8] sm:$0xff]  ;;  %v406_v55 = vld [vmem:[#allocation2 + $0x118] sm:$0xff]  ;;  %v395_v56 = vld [vmem:[#allocation2 + $0xc0] sm:$0xff] }
  0x37   : > { %712 = vmatprep.subr.mxu0 %v462_v27  ;;  %640 = vmatpush1.msra.mxu1 %v443_v32  ;;  %v405_v57 = vld [vmem:[#allocation2 + $0x110] sm:$0xff]  ;;  %v388_v58 = vld [vmem:[#allocation2 + $0x88] sm:$0xff]  ;;  %v398_v59 = vld [vmem:[#allocation2 + $0xd8] sm:$0xff] }
  0x38   : > { %713 = vmatpush1.msra.mxu0 %v461_v29  ;;  %641 = vmatprep.subr.mxu1 %v436_v34  ;;  %v387_v60 = vld [vmem:[#allocation2 + $0x80] sm:$0xff]  ;;  %v397_v61 = vld [vmem:[#allocation2 + $0xd0] sm:$0xff]  ;;  %v380_v62 = vld [vmem:[#allocation2 + $0x48] sm:$0xff] }
  0x39   : > { %714 = vmatprep.subr.mxu0 %v454_v31  ;;  %642 = vmatpush1.msra.mxu1 %v435_v36  ;;  %v390_v63 = vld [vmem:[#allocation2 + $0x98] sm:$0xff]  ;;  %v379_v1 = vld [vmem:[#allocation2 + $0x40] sm:$0xff]  ;;  %v389_v2 = vld [vmem:[#allocation2 + $0x90] sm:$0xff] }
  0x3a   : > { %715 = vmatpush1.msra.mxu0 %v453_v33  ;;  %643 = vmatprep.subr.mxu1 %v428_v38  ;;  %v372_v3 = vld [vmem:[#allocation2 + $0x8] sm:$0xff]  ;;  %v382_v4 = vld [vmem:[#allocation2 + $0x58] sm:$0xff]  ;;  %v371_v5 = vld [vmem:[#allocation2] sm:$0xff] }
  0x3b   : > { %716 = vmatprep.subr.mxu0 %v446_v35  ;;  %644 = vmatpush1.msra.mxu1 %v427_v40  ;;  %v381_v6 = vld [vmem:[#allocation2 + $0x50] sm:$0xff]  ;;  %v620_v7 = vld [vmem:[#allocation2 + $0x7c8] sm:$0xff]  ;;  %v374_v8 = vld [vmem:[#allocation2 + $0x18] sm:$0xff] }
  0x3c   : > { %717 = vmatpush1.msra.mxu0 %v445_v37  ;;  %645 = vmatprep.subr.mxu1 %v420_v42  ;;  %v619_v9 = vld [vmem:[#allocation2 + $0x7c0] sm:$0xff]  ;;  %v373_v10 = vld [vmem:[#allocation2 + $0x10] sm:$0xff]  ;;  %v612_v11 = vld [vmem:[#allocation2 + $0x788] sm:$0xff] }
  0x3d   : > { %718 = vmatprep.subr.mxu0 %v438_v39  ;;  %646 = vmatpush1.msra.mxu1 %v419_v44  ;;  %v622_v12 = vld [vmem:[#allocation2 + $0x7d8] sm:$0xff]  ;;  %v611_v13 = vld [vmem:[#allocation2 + $0x780] sm:$0xff]  ;;  %v621_v14 = vld [vmem:[#allocation2 + $0x7d0] sm:$0xff] }
  0x3e   : > { %719 = vmatpush1.msra.mxu0 %v437_v41  ;;  %647 = vmatprep.subr.mxu1 %v412_v46  ;;  %v604_v15 = vld [vmem:[#allocation2 + $0x748] sm:$0xff]  ;;  %v614_v16 = vld [vmem:[#allocation2 + $0x798] sm:$0xff]  ;;  %v603_v17 = vld [vmem:[#allocation2 + $0x740] sm:$0xff] }
  0x3f   : > { %720 = vmatprep.subr.mxu0 %v430_v43  ;;  %648 = vmatpush1.msra.mxu1 %v411_v48  ;;  %v613_v18 = vld [vmem:[#allocation2 + $0x790] sm:$0xff]  ;;  %v596_v19 = vld [vmem:[#allocation2 + $0x708] sm:$0xff]  ;;  %v606_v20 = vld [vmem:[#allocation2 + $0x758] sm:$0xff] }
  0x40   : > { %721 = vmatpush1.msra.mxu0 %v429_v45  ;;  %649 = vmatprep.subr.mxu1 %v404_v50  ;;  %v595_v21 = vld [vmem:[#allocation2 + $0x700] sm:$0xff]  ;;  %v605_v22 = vld [vmem:[#allocation2 + $0x750] sm:$0xff]  ;;  %v588_v23 = vld [vmem:[#allocation2 + $0x6c8] sm:$0xff] }
  0x41   : > { %722 = vmatprep.subr.mxu0 %v422_v47  ;;  %650 = vmatpush1.msra.mxu1 %v403_v52  ;;  %v598_v24 = vld [vmem:[#allocation2 + $0x718] sm:$0xff]  ;;  %v587_v25 = vld [vmem:[#allocation2 + $0x6c0] sm:$0xff]  ;;  %v597_v26 = vld [vmem:[#allocation2 + $0x710] sm:$0xff] }
  0x42   : > { %723 = vmatpush1.msra.mxu0 %v421_v49  ;;  %651 = vmatprep.subr.mxu1 %v396_v54  ;;  %v580_v27 = vld [vmem:[#allocation2 + $0x688] sm:$0xff]  ;;  %v590_v28 = vld [vmem:[#allocation2 + $0x6d8] sm:$0xff]  ;;  %v579_v29 = vld [vmem:[#allocation2 + $0x680] sm:$0xff] }
  0x43   : > { %724 = vmatprep.subr.mxu0 %v414_v51  ;;  %652 = vmatpush1.msra.mxu1 %v395_v56  ;;  %v589_v30 = vld [vmem:[#allocation2 + $0x6d0] sm:$0xff]  ;;  %v572_v31 = vld [vmem:[#allocation2 + $0x648] sm:$0xff]  ;;  %v582_v32 = vld [vmem:[#allocation2 + $0x698] sm:$0xff] }
  0x44   : > { %725 = vmatpush1.msra.mxu0 %v413_v53  ;;  %653 = vmatprep.subr.mxu1 %v388_v58  ;;  %v571_v33 = vld [vmem:[#allocation2 + $0x640] sm:$0xff]  ;;  %v581_v34 = vld [vmem:[#allocation2 + $0x690] sm:$0xff]  ;;  %v564_v35 = vld [vmem:[#allocation2 + $0x608] sm:$0xff] }
  0x45   : > { %726 = vmatprep.subr.mxu0 %v406_v55  ;;  %654 = vmatpush1.msra.mxu1 %v387_v60  ;;  %v574_v36 = vld [vmem:[#allocation2 + $0x658] sm:$0xff]  ;;  %v563_v37 = vld [vmem:[#allocation2 + $0x600] sm:$0xff]  ;;  %v573_v38 = vld [vmem:[#allocation2 + $0x650] sm:$0xff] }
  0x46   : > { %727 = vmatpush1.msra.mxu0 %v405_v57  ;;  %655 = vmatprep.subr.mxu1 %v380_v62  ;;  %v556_v39 = vld [vmem:[#allocation2 + $0x5c8] sm:$0xff]  ;;  %v566_v40 = vld [vmem:[#allocation2 + $0x618] sm:$0xff]  ;;  %v555_v41 = vld [vmem:[#allocation2 + $0x5c0] sm:$0xff] }
  0x47   : > { %728 = vmatprep.subr.mxu0 %v398_v59  ;;  %656 = vmatpush1.msra.mxu1 %v379_v1  ;;  %v565_v42 = vld [vmem:[#allocation2 + $0x610] sm:$0xff]  ;;  %v548_v43 = vld [vmem:[#allocation2 + $0x588] sm:$0xff]  ;;  %v558_v44 = vld [vmem:[#allocation2 + $0x5d8] sm:$0xff] }
  0x48   : > { %729 = vmatpush1.msra.mxu0 %v397_v61  ;;  %657 = vmatprep.subr.mxu1 %v372_v3  ;;  %v547_v45 = vld [vmem:[#allocation2 + $0x580] sm:$0xff]  ;;  %v557_v46 = vld [vmem:[#allocation2 + $0x5d0] sm:$0xff]  ;;  %v540_v47 = vld [vmem:[#allocation2 + $0x548] sm:$0xff] }
  0x49   : > { %730 = vmatprep.subr.mxu0 %v390_v63  ;;  %658 = vmatpush1.msra.mxu1 %v371_v5  ;;  %v550_v48 = vld [vmem:[#allocation2 + $0x598] sm:$0xff]  ;;  %v539_v49 = vld [vmem:[#allocation2 + $0x540] sm:$0xff]  ;;  %v549_v50 = vld [vmem:[#allocation2 + $0x590] sm:$0xff] }
  0x4a   : > { %731 = vmatpush1.msra.mxu0 %v389_v2  ;;  %659 = vmatprep.subr.mxu1 %v620_v7  ;;  %v532_v51 = vld [vmem:[#allocation2 + $0x508] sm:$0xff]  ;;  %v542_v52 = vld [vmem:[#allocation2 + $0x558] sm:$0xff]  ;;  %v531_v53 = vld [vmem:[#allocation2 + $0x500] sm:$0xff] }
  0x4b   : > { %732 = vmatprep.subr.mxu0 %v382_v4  ;;  %660 = vmatpush2.msra.mxu1 %v619_v9  ;;  %v541_v54 = vld [vmem:[#allocation2 + $0x550] sm:$0xff]  ;;  %v524_v55 = vld [vmem:[#allocation2 + $0x4c8] sm:$0xff]  ;;  %v534_v56 = vld [vmem:[#allocation2 + $0x518] sm:$0xff] }
  0x4c   : > { %733 = vmatpush1.msra.mxu0 %v381_v6  ;;  %661 = vmatprep.subr.mxu1 %v612_v11  ;;  %v523_v57 = vld [vmem:[#allocation2 + $0x4c0] sm:$0xff]  ;;  %v533_v58 = vld [vmem:[#allocation2 + $0x510] sm:$0xff]  ;;  %v516_v59 = vld [vmem:[#allocation2 + $0x488] sm:$0xff] }
  0x4d   : > { %734 = vmatprep.subr.mxu0 %v374_v8  ;;  %662 = vmatpush2.msra.mxu1 %v611_v13  ;;  %v526_v60 = vld [vmem:[#allocation2 + $0x4d8] sm:$0xff]  ;;  %v525_v61 = vld [vmem:[#allocation2 + $0x4d0] sm:$0xff]  ;;  %v515_v63 = vld [vmem:[#allocation2 + $0x480] sm:$0xff] }
  0x4e   : > { %735 = vmatpush1.msra.mxu0 %v373_v10  ;;  %663 = vmatprep.subr.mxu1 %v604_v15  ;;  %v518_v62 = vld [vmem:[#allocation2 + $0x498] sm:$0xff]  ;;  %v517_v1 = vld [vmem:[#allocation2 + $0x490] sm:$0xff]  ;;  %v508_v2 = vld [vmem:[#allocation2 + $0x448] sm:$0xff] }
  0x4f   : > { %736 = vmatprep.subr.mxu0 %v622_v12  ;;  %664 = vmatpush2.msra.mxu1 %v603_v17  ;;  %v510_v3 = vld [vmem:[#allocation2 + $0x458] sm:$0xff]  ;;  %v507_v4 = vld [vmem:[#allocation2 + $0x440] sm:$0xff]  ;;  %v509_v5 = vld [vmem:[#allocation2 + $0x450] sm:$0xff] }
  0x50   : > { %737 = vmatpush2.msra.mxu0 %v621_v14  ;;  %665 = vmatprep.subr.mxu1 %v596_v19  ;;  %v500_v6 = vld [vmem:[#allocation2 + $0x408] sm:$0xff]  ;;  %v502_v7 = vld [vmem:[#allocation2 + $0x418] sm:$0xff]  ;;  %v499_v8 = vld [vmem:[#allocation2 + $0x400] sm:$0xff] }
  0x51   : > { %738 = vmatprep.subr.mxu0 %v614_v16  ;;  %666 = vmatpush2.msra.mxu1 %v595_v21  ;;  %v501_v9 = vld [vmem:[#allocation2 + $0x410] sm:$0xff]  ;;  %v496_v10 = vld [vmem:[#allocation2 + $0x3e8] sm:$0xff]  ;;  %v498_v11 = vld [vmem:[#allocation2 + $0x3f8] sm:$0xff] }
  0x52   : > { %739 = vmatpush2.msra.mxu0 %v613_v18  ;;  %667 = vmatprep.subr.mxu1 %v588_v23  ;;  %v495_v18 = vld [vmem:[#allocation2 + $0x3e0] sm:$0xff]  ;;  %v497_v19 = vld [vmem:[#allocation2 + $0x3f0] sm:$0xff]  ;;  %v490_v21 = vld [vmem:[#allocation2 + $0x3b8] sm:$0xff] }
  0x53   : > { %740 = vmatprep.subr.mxu0 %v606_v20  ;;  %668 = vmatpush2.msra.mxu1 %v587_v25  ;;  %v488_v20 = vld [vmem:[#allocation2 + $0x3a8] sm:$0xff]  ;;  %v489_v25 = vld [vmem:[#allocation2 + $0x3b0] sm:$0xff] }
  0x54   : > { %741 = vmatpush2.msra.mxu0 %v605_v22  ;;  %669 = vmatprep.subr.mxu1 %v580_v27  ;;  %v480_v27 = vld [vmem:[#allocation2 + $0x368] sm:$0xff] }
  0x55   : > { %742 = vmatprep.subr.mxu0 %v598_v24  ;;  %670 = vmatpush2.msra.mxu1 %v579_v29  ;;  %v487_v24 = vld [vmem:[#allocation2 + $0x3a0] sm:$0xff] }
  0x56   : > { %743 = vmatpush2.msra.mxu0 %v597_v26  ;;  %671 = vmatprep.subr.mxu1 %v572_v31  ;;  %v481_v31 = vld [vmem:[#allocation2 + $0x370] sm:$0xff] }
  0x57   : > { %744 = vmatprep.subr.mxu0 %v590_v28  ;;  %672 = vmatpush2.msra.mxu1 %v571_v33  ;;  %v482_v28 = vld [vmem:[#allocation2 + $0x378] sm:$0xff] }
  0x58   : > { %745 = vmatpush2.msra.mxu0 %v589_v30  ;;  %673 = vmatprep.subr.mxu1 %v564_v35  ;;  %v479_v30 = vld [vmem:[#allocation2 + $0x360] sm:$0xff]  ;;  %v474_v33 = vld [vmem:[#allocation2 + $0x338] sm:$0xff]  ;;  %v473_v35 = vld [vmem:[#allocation2 + $0x330] sm:$0xff] }
  0x59   : > { %746 = vmatprep.subr.mxu0 %v582_v32  ;;  %674 = vmatpush2.msra.mxu1 %v563_v37  ;;  %v472_v32 = vld [vmem:[#allocation2 + $0x328] sm:$0xff]  ;;  %v466_v37 = vld [vmem:[#allocation2 + $0x2f8] sm:$0xff] }
  0x5a   : > { %747 = vmatpush2.msra.mxu0 %v581_v34  ;;  %675 = vmatprep.subr.mxu1 %v556_v39  ;;  %v471_v34 = vld [vmem:[#allocation2 + $0x320] sm:$0xff]  ;;  %v465_v39 = vld [vmem:[#allocation2 + $0x2f0] sm:$0xff] }
  0x5b   : > { %748 = vmatprep.subr.mxu0 %v574_v36  ;;  %676 = vmatpush2.msra.mxu1 %v555_v41  ;;  %v464_v36 = vld [vmem:[#allocation2 + $0x2e8] sm:$0xff]  ;;  %v458_v41 = vld [vmem:[#allocation2 + $0x2b8] sm:$0xff] }
  0x5c   : > { %749 = vmatpush2.msra.mxu0 %v573_v38  ;;  %677 = vmatprep.subr.mxu1 %v548_v43  ;;  %v463_v38 = vld [vmem:[#allocation2 + $0x2e0] sm:$0xff]  ;;  %v457_v43 = vld [vmem:[#allocation2 + $0x2b0] sm:$0xff] }
  0x5d   : > { %750 = vmatprep.subr.mxu0 %v566_v40  ;;  %678 = vmatpush2.msra.mxu1 %v547_v45  ;;  %v456_v40 = vld [vmem:[#allocation2 + $0x2a8] sm:$0xff]  ;;  %v450_v45 = vld [vmem:[#allocation2 + $0x278] sm:$0xff] }
  0x5e   : > { %751 = vmatpush2.msra.mxu0 %v565_v42  ;;  %679 = vmatprep.subr.mxu1 %v540_v47  ;;  %v455_v42 = vld [vmem:[#allocation2 + $0x2a0] sm:$0xff]  ;;  %v449_v47 = vld [vmem:[#allocation2 + $0x270] sm:$0xff] }
  0x5f   : > { %752 = vmatprep.subr.mxu0 %v558_v44  ;;  %680 = vmatpush2.msra.mxu1 %v539_v49  ;;  %v448_v44 = vld [vmem:[#allocation2 + $0x268] sm:$0xff]  ;;  %v442_v49 = vld [vmem:[#allocation2 + $0x238] sm:$0xff] }
  0x60   : > { %753 = vmatpush2.msra.mxu0 %v557_v46  ;;  %681 = vmatprep.subr.mxu1 %v532_v51  ;;  %v447_v46 = vld [vmem:[#allocation2 + $0x260] sm:$0xff]  ;;  %v441_v51 = vld [vmem:[#allocation2 + $0x230] sm:$0xff] }
  0x61   : > { %754 = vmatprep.subr.mxu0 %v550_v48  ;;  %682 = vmatpush2.msra.mxu1 %v531_v53  ;;  %v440_v48 = vld [vmem:[#allocation2 + $0x228] sm:$0xff]  ;;  %v434_v53 = vld [vmem:[#allocation2 + $0x1f8] sm:$0xff] }
  0x62   : > { %755 = vmatpush2.msra.mxu0 %v549_v50  ;;  %683 = vmatprep.subr.mxu1 %v524_v55  ;;  %v439_v50 = vld [vmem:[#allocation2 + $0x220] sm:$0xff]  ;;  %v433_v55 = vld [vmem:[#allocation2 + $0x1f0] sm:$0xff] }
  0x63   : > { %756 = vmatprep.subr.mxu0 %v542_v52  ;;  %684 = vmatpush2.msra.mxu1 %v523_v57  ;;  %v432_v52 = vld [vmem:[#allocation2 + $0x1e8] sm:$0xff]  ;;  %v426_v57 = vld [vmem:[#allocation2 + $0x1b8] sm:$0xff] }
  0x64   : > { %757 = vmatpush2.msra.mxu0 %v541_v54  ;;  %685 = vmatprep.subr.mxu1 %v516_v59  ;;  %v431_v54 = vld [vmem:[#allocation2 + $0x1e0] sm:$0xff]  ;;  %v425_v59 = vld [vmem:[#allocation2 + $0x1b0] sm:$0xff] }
  0x65   : > { %758 = vmatprep.subr.mxu0 %v534_v56  ;;  %686 = vmatpush2.msra.mxu1 %v515_v63  ;;  %v424_v56 = vld [vmem:[#allocation2 + $0x1a8] sm:$0xff]  ;;  %v417_v63 = vld [vmem:[#allocation2 + $0x170] sm:$0xff] }
  0x66   : > { %759 = vmatpush2.msra.mxu0 %v533_v58  ;;  %687 = vmatprep.subr.mxu1 %v508_v2  ;;  %v423_v58 = vld [vmem:[#allocation2 + $0x1a0] sm:$0xff]  ;;  %v410_v2 = vld [vmem:[#allocation2 + $0x138] sm:$0xff] }
  0x67   : > { %760 = vmatprep.subr.mxu0 %v526_v60  ;;  %688 = vmatpush2.msra.mxu1 %v507_v4  ;;  %v416_v60 = vld [vmem:[#allocation2 + $0x168] sm:$0xff]  ;;  %v409_v4 = vld [vmem:[#allocation2 + $0x130] sm:$0xff] }
  0x68   : > { %761 = vmatpush2.msra.mxu0 %v525_v61  ;;  %689 = vmatprep.subr.mxu1 %v500_v6  ;;  %v418_v61 = vld [vmem:[#allocation2 + $0x178] sm:$0xff] }
  0x69   : > { %762 = vmatprep.subr.mxu0 %v518_v62  ;;  %690 = vmatpush2.msra.mxu1 %v499_v8  ;;  %v415_v62 = vld [vmem:[#allocation2 + $0x160] sm:$0xff]  ;;  %v402_v6 = vld [vmem:[#allocation2 + $0xf8] sm:$0xff]  ;;  %v401_v8 = vld [vmem:[#allocation2 + $0xf0] sm:$0xff] }
  0x6a   : > { %763 = vmatpush2.msra.mxu0 %v517_v1  ;;  %781 = vmatprep.subr.mxu1 %v496_v10  ;;  %v408_v1 = vld [vmem:[#allocation2 + $0x128] sm:$0xff]  ;;  %v394_v10 = vld [vmem:[#allocation2 + $0xb8] sm:$0xff] }
  0x6b   : > { %764 = vmatprep.subr.mxu0 %v510_v3  ;;  %v407_v3 = vld [vmem:[#allocation2 + $0x120] sm:$0xff] }
  0x6c   : > { %765 = vmatpush2.msra.mxu0 %v509_v5  ;;  %v400_v5 = vld [vmem:[#allocation2 + $0xe8] sm:$0xff] }
  0x6d   : > { %766 = vmatprep.subr.mxu0 %v502_v7  ;;  %v399_v7 = vld [vmem:[#allocation2 + $0xe0] sm:$0xff] }
  0x6e   : > { %767 = vmatpush2.msra.mxu0 %v501_v9  ;;  %v392_v9 = vld [vmem:[#allocation2 + $0xa8] sm:$0xff] }
  0x6f   : > { %858 = vmatprep.subr.mxu0 %v498_v11  ;;  %v391_v11 = vld [vmem:[#allocation2 + $0xa0] sm:$0xff] }
  0xa1   : > { %v273_v12 = vpop.permute.xlu0 %272 }
  0xa5   : > { %v278_v22 = vpop.permute.xlu0 %277 }
  0xef   : > { %v360_v13 = vpop.f32.mrf.mxu0 }
  0xf0   : > { %v1641_v16 = vadd.f32 %v360_v13, %v273_v12  ;;  %v384_v13 = vld [vmem:[#allocation2 + $0x68] sm:$0xff] }
  0xf1   : > { %v362_v14 = vpop.f32.mrf.mxu0 }
  0xf2   : > { %v363_v15 = vadd.f32 %v362_v14, %v273_v12  ;;  %v393_v12 = vld [vmem:[#allocation2 + $0xb0] sm:$0xff]  ;;  %v386_v14 = vld [vmem:[#allocation2 + $0x78] sm:$0xff] }
  0xf3   : > { %v366_v17 = vpop.f32.mrf.mxu0 }
  0xf4   : > { %691 = vmatprep.mubr.f32.mxu1 %v363_v15  ;;  %768 = vmatprep.mubr.f32.mxu0 %v363_v15  ;;  %v1647_v29 = vadd.f32 %v366_v17, %v278_v22  ;;  %v385_v17 = vld [vmem:[#allocation2 + $0x70] sm:$0xff] }
  0xf5   : > { %v368_v23 = vpop.f32.mrf.mxu0  ;;  %692 = vmatmul.mubr.f32.vlgmr.msra.gmra.mxu1 %v1641_v16  ;;  %769 = vmatmul.mubr.f32.vlgmr.msra.gmra.mxu0 %v1641_v16 }
  0xf6   : > { %v1645_v26 = vadd.f32 %v368_v23, %v278_v22  ;;  %782 = vmatpush1.msra.mxu1 %v495_v18  ;;  %859 = vmatpush1.msra.mxu0 %v497_v19  ;;  %v376_v18 = vld [vmem:[#allocation2 + $0x28] sm:$0xff]  ;;  %v378_v19 = vld [vmem:[#allocation2 + $0x38] sm:$0xff] }
  0xf7   : > { %783 = vmatprep.subr.mxu1 %v488_v20  ;;  %860 = vmatprep.subr.mxu0 %v490_v21  ;;  %v375_v20 = vld [vmem:[#allocation2 + $0x20] sm:$0xff]  ;;  %v377_v21 = vld [vmem:[#allocation2 + $0x30] sm:$0xff]  ;;  %v624_v22 = vld [vmem:[#allocation2 + $0x7e8] sm:$0xff] }
  0xf8   : > { %784 = vmatpush1.msra.mxu1 %v487_v24  ;;  %861 = vmatpush1.msra.mxu0 %v489_v25  ;;  %v626_v23 = vld [vmem:[#allocation2 + $0x7f8] sm:$0xff]  ;;  %v623_v24 = vld [vmem:[#allocation2 + $0x7e0] sm:$0xff]  ;;  %v625_v25 = vld [vmem:[#allocation2 + $0x7f0] sm:$0xff] }
  0xf9   : > { %697 = vmatprep.mubr.f32.mxu1 %v1645_v26  ;;  %774 = vmatprep.mubr.f32.mxu0 %v1645_v26 }
  0xfa   : > { %785 = vmatprep.subr.mxu1 %v480_v27  ;;  %862 = vmatprep.subr.mxu0 %v482_v28  ;;  %v616_v27 = vld [vmem:[#allocation2 + $0x7a8] sm:$0xff]  ;;  %v618_v28 = vld [vmem:[#allocation2 + $0x7b8] sm:$0xff] }
  0xfb   : > { %698 = vmatmul.mubr.f32.gmra.mxu1 %v1647_v29  ;;  %775 = vmatmul.mubr.f32.gmra.mxu0 %v1647_v29 }
  0xfc   : > { %786 = vmatpush1.msra.mxu1 %v479_v30  ;;  %863 = vmatpush1.msra.mxu0 %v481_v31  ;;  %v615_v30 = vld [vmem:[#allocation2 + $0x7a0] sm:$0xff]  ;;  %v617_v31 = vld [vmem:[#allocation2 + $0x7b0] sm:$0xff] }
  0xfd   : > { %787 = vmatprep.subr.mxu1 %v472_v32  ;;  %845 = vmatprep.mubr.f32.mxu1 %v363_v15  ;;  %v608_v32 = vld [vmem:[#allocation2 + $0x768] sm:$0xff] }
  0xfe   : > { %864 = vmatprep.subr.mxu0 %v474_v33  ;;  %922 = vmatprep.mubr.f32.mxu0 %v363_v15  ;;  %v383_v15 = vld [vmem:[#allocation2 + $0x60] sm:$0xff]  ;;  %v610_v33 = vld [vmem:[#allocation2 + $0x778] sm:$0xff] }
  0xff   : > { %788 = vmatpush1.msra.mxu1 %v471_v34  ;;  %865 = vmatpush1.msra.mxu0 %v473_v35  ;;  %v607_v34 = vld [vmem:[#allocation2 + $0x760] sm:$0xff]  ;;  %v609_v35 = vld [vmem:[#allocation2 + $0x770] sm:$0xff] }
 0x100   : > { %789 = vmatprep.subr.mxu1 %v464_v36  ;;  %866 = vmatprep.subr.mxu0 %v466_v37  ;;  %v600_v36 = vld [vmem:[#allocation2 + $0x728] sm:$0xff]  ;;  %v602_v37 = vld [vmem:[#allocation2 + $0x738] sm:$0xff] }
 0x101   : > { %790 = vmatpush1.msra.mxu1 %v463_v38  ;;  %867 = vmatpush1.msra.mxu0 %v465_v39  ;;  %v599_v38 = vld [vmem:[#allocation2 + $0x720] sm:$0xff]  ;;  %v601_v39 = vld [vmem:[#allocation2 + $0x730] sm:$0xff] }
 0x102   : > { %791 = vmatprep.subr.mxu1 %v456_v40  ;;  %868 = vmatprep.subr.mxu0 %v458_v41  ;;  %v592_v40 = vld [vmem:[#allocation2 + $0x6e8] sm:$0xff]  ;;  %v594_v41 = vld [vmem:[#allocation2 + $0x6f8] sm:$0xff] }
 0x103   : > { %792 = vmatpush1.msra.mxu1 %v455_v42  ;;  %869 = vmatpush1.msra.mxu0 %v457_v43  ;;  %v591_v42 = vld [vmem:[#allocation2 + $0x6e0] sm:$0xff]  ;;  %v593_v43 = vld [vmem:[#allocation2 + $0x6f0] sm:$0xff] }
 0x104   : > { %793 = vmatprep.subr.mxu1 %v448_v44  ;;  %870 = vmatprep.subr.mxu0 %v450_v45  ;;  %v584_v44 = vld [vmem:[#allocation2 + $0x6a8] sm:$0xff]  ;;  %v586_v45 = vld [vmem:[#allocation2 + $0x6b8] sm:$0xff] }
 0x105   : > { %794 = vmatpush1.msra.mxu1 %v447_v46  ;;  %871 = vmatpush1.msra.mxu0 %v449_v47  ;;  %v583_v46 = vld [vmem:[#allocation2 + $0x6a0] sm:$0xff]  ;;  %v585_v47 = vld [vmem:[#allocation2 + $0x6b0] sm:$0xff] }
 0x106   : > { %795 = vmatprep.subr.mxu1 %v440_v48  ;;  %872 = vmatprep.subr.mxu0 %v442_v49  ;;  %v576_v48 = vld [vmem:[#allocation2 + $0x668] sm:$0xff]  ;;  %v578_v49 = vld [vmem:[#allocation2 + $0x678] sm:$0xff] }
 0x107   : > { %796 = vmatpush1.msra.mxu1 %v439_v50  ;;  %873 = vmatpush1.msra.mxu0 %v441_v51  ;;  %v575_v50 = vld [vmem:[#allocation2 + $0x660] sm:$0xff]  ;;  %v577_v51 = vld [vmem:[#allocation2 + $0x670] sm:$0xff] }
 0x108   : > { %797 = vmatprep.subr.mxu1 %v432_v52  ;;  %874 = vmatprep.subr.mxu0 %v434_v53  ;;  %v568_v52 = vld [vmem:[#allocation2 + $0x628] sm:$0xff]  ;;  %v570_v53 = vld [vmem:[#allocation2 + $0x638] sm:$0xff] }
 0x109   : > { %798 = vmatpush1.msra.mxu1 %v431_v54  ;;  %875 = vmatpush1.msra.mxu0 %v433_v55  ;;  %v567_v54 = vld [vmem:[#allocation2 + $0x620] sm:$0xff]  ;;  %v569_v55 = vld [vmem:[#allocation2 + $0x630] sm:$0xff] }
 0x10a   : > { %799 = vmatprep.subr.mxu1 %v424_v56  ;;  %876 = vmatprep.subr.mxu0 %v426_v57  ;;  %v560_v56 = vld [vmem:[#allocation2 + $0x5e8] sm:$0xff]  ;;  %v562_v57 = vld [vmem:[#allocation2 + $0x5f8] sm:$0xff] }
 0x10b   : > { %800 = vmatpush1.msra.mxu1 %v423_v58  ;;  %877 = vmatpush1.msra.mxu0 %v425_v59  ;;  %v559_v58 = vld [vmem:[#allocation2 + $0x5e0] sm:$0xff]  ;;  %v561_v59 = vld [vmem:[#allocation2 + $0x5f0] sm:$0xff] }
 0x10c   : > { %801 = vmatprep.subr.mxu1 %v416_v60  ;;  %878 = vmatprep.subr.mxu0 %v418_v61  ;;  %v552_v60 = vld [vmem:[#allocation2 + $0x5a8] sm:$0xff]  ;;  %v554_v61 = vld [vmem:[#allocation2 + $0x5b8] sm:$0xff] }
 0x10d   : > { %802 = vmatpush1.msra.mxu1 %v415_v62  ;;  %879 = vmatpush1.msra.mxu0 %v417_v63  ;;  %v551_v62 = vld [vmem:[#allocation2 + $0x5a0] sm:$0xff]  ;;  %v553_v63 = vld [vmem:[#allocation2 + $0x5b0] sm:$0xff] }
 0x10e   : > { %803 = vmatprep.subr.mxu1 %v408_v1  ;;  %880 = vmatprep.subr.mxu0 %v410_v2  ;;  %v544_v1 = vld [vmem:[#allocation2 + $0x568] sm:$0xff]  ;;  %v546_v2 = vld [vmem:[#allocation2 + $0x578] sm:$0xff] }
 0x10f   : > { %804 = vmatpush1.msra.mxu1 %v407_v3  ;;  %881 = vmatpush1.msra.mxu0 %v409_v4  ;;  %v543_v3 = vld [vmem:[#allocation2 + $0x560] sm:$0xff]  ;;  %v545_v4 = vld [vmem:[#allocation2 + $0x570] sm:$0xff] }
 0x110   : > { %805 = vmatprep.subr.mxu1 %v400_v5  ;;  %882 = vmatprep.subr.mxu0 %v402_v6  ;;  %v536_v5 = vld [vmem:[#allocation2 + $0x528] sm:$0xff]  ;;  %v538_v6 = vld [vmem:[#allocation2 + $0x538] sm:$0xff] }
 0x111   : > { %806 = vmatpush1.msra.mxu1 %v399_v7  ;;  %883 = vmatpush1.msra.mxu0 %v401_v8  ;;  %v535_v7 = vld [vmem:[#allocation2 + $0x520] sm:$0xff]  ;;  %v537_v8 = vld [vmem:[#allocation2 + $0x530] sm:$0xff] }
 0x112   : > { %807 = vmatprep.subr.mxu1 %v392_v9  ;;  %884 = vmatprep.subr.mxu0 %v394_v10  ;;  %v528_v9 = vld [vmem:[#allocation2 + $0x4e8] sm:$0xff]  ;;  %v530_v10 = vld [vmem:[#allocation2 + $0x4f8] sm:$0xff] }
 0x113   : > { %808 = vmatpush1.msra.mxu1 %v391_v11  ;;  %885 = vmatpush1.msra.mxu0 %v393_v12  ;;  %v527_v11 = vld [vmem:[#allocation2 + $0x4e0] sm:$0xff]  ;;  %v529_v12 = vld [vmem:[#allocation2 + $0x4f0] sm:$0xff] }
 0x114   : > { %809 = vmatprep.subr.mxu1 %v384_v13  ;;  %886 = vmatprep.subr.mxu0 %v386_v14  ;;  %v520_v13 = vld [vmem:[#allocation2 + $0x4a8] sm:$0xff]  ;;  %v522_v14 = vld [vmem:[#allocation2 + $0x4b8] sm:$0xff] }
 0x115   : > { %810 = vmatpush1.msra.mxu1 %v383_v15  ;;  %887 = vmatpush1.msra.mxu0 %v385_v17  ;;  %v519_v15 = vld [vmem:[#allocation2 + $0x4a0] sm:$0xff]  ;;  %v521_v17 = vld [vmem:[#allocation2 + $0x4b0] sm:$0xff] }
 0x116   : > { %811 = vmatprep.subr.mxu1 %v376_v18  ;;  %888 = vmatprep.subr.mxu0 %v378_v19  ;;  %v512_v18 = vld [vmem:[#allocation2 + $0x468] sm:$0xff]  ;;  %v514_v19 = vld [vmem:[#allocation2 + $0x478] sm:$0xff] }
 0x117   : > { %812 = vmatpush1.msra.mxu1 %v375_v20  ;;  %889 = vmatpush1.msra.mxu0 %v377_v21  ;;  %v511_v20 = vld [vmem:[#allocation2 + $0x460] sm:$0xff]  ;;  %v513_v21 = vld [vmem:[#allocation2 + $0x470] sm:$0xff] }
 0x118   : > { %813 = vmatprep.subr.mxu1 %v624_v22  ;;  %890 = vmatprep.subr.mxu0 %v626_v23  ;;  %v504_v22 = vld [vmem:[#allocation2 + $0x428] sm:$0xff]  ;;  %v506_v23 = vld [vmem:[#allocation2 + $0x438] sm:$0xff] }
 0x119   : > { %814 = vmatpush2.msra.mxu1 %v623_v24  ;;  %891 = vmatpush2.msra.mxu0 %v625_v25  ;;  %v503_v24 = vld [vmem:[#allocation2 + $0x420] sm:$0xff]  ;;  %v505_v25 = vld [vmem:[#allocation2 + $0x430] sm:$0xff] }
 0x11a   : > { %815 = vmatprep.subr.mxu1 %v616_v27  ;;  %892 = vmatprep.subr.mxu0 %v618_v28  ;;  %v944_v27 = vld [vmem:[%s1722_s5] sm:$0xff] }
 0x11b   : > { %816 = vmatpush2.msra.mxu1 %v615_v30  ;;  %893 = vmatpush2.msra.mxu0 %v617_v31 }
 0x11c   : > { %817 = vmatprep.subr.mxu1 %v608_v32  ;;  %894 = vmatprep.subr.mxu0 %v610_v33 }
 0x11d   : > { %818 = vmatpush2.msra.mxu1 %v607_v34  ;;  %895 = vmatpush2.msra.mxu0 %v609_v35 }
 0x11e   : > { %819 = vmatprep.subr.mxu1 %v600_v36  ;;  %896 = vmatprep.subr.mxu0 %v602_v37 }
 0x11f   : > { %820 = vmatpush2.msra.mxu1 %v599_v38  ;;  %897 = vmatpush2.msra.mxu0 %v601_v39 }
 0x120   : > { %821 = vmatprep.subr.mxu1 %v592_v40  ;;  %898 = vmatprep.subr.mxu0 %v594_v41 }
 0x121   : > { %822 = vmatpush2.msra.mxu1 %v591_v42  ;;  %899 = vmatpush2.msra.mxu0 %v593_v43 }
 0x122   : > { %823 = vmatprep.subr.mxu1 %v584_v44  ;;  %900 = vmatprep.subr.mxu0 %v586_v45 }
 0x123   : > { %824 = vmatpush2.msra.mxu1 %v583_v46  ;;  %901 = vmatpush2.msra.mxu0 %v585_v47 }
 0x124   : > { %825 = vmatprep.subr.mxu1 %v576_v48  ;;  %902 = vmatprep.subr.mxu0 %v578_v49 }
 0x125   : > { %826 = vmatpush2.msra.mxu1 %v575_v50  ;;  %903 = vmatpush2.msra.mxu0 %v577_v51 }
 0x126   : > { %827 = vmatprep.subr.mxu1 %v568_v52  ;;  %904 = vmatprep.subr.mxu0 %v570_v53 }
 0x127   : > { %828 = vmatpush2.msra.mxu1 %v567_v54  ;;  %905 = vmatpush2.msra.mxu0 %v569_v55 }
 0x128   : > { %829 = vmatprep.subr.mxu1 %v560_v56  ;;  %906 = vmatprep.subr.mxu0 %v562_v57 }
 0x129   : > { %830 = vmatpush2.msra.mxu1 %v559_v58  ;;  %907 = vmatpush2.msra.mxu0 %v561_v59 }
 0x12a   : > { %831 = vmatprep.subr.mxu1 %v552_v60  ;;  %908 = vmatprep.subr.mxu0 %v554_v61 }
 0x12b   : > { %832 = vmatpush2.msra.mxu1 %v551_v62  ;;  %909 = vmatpush2.msra.mxu0 %v553_v63 }
 0x12c   : > { %833 = vmatprep.subr.mxu1 %v544_v1  ;;  %910 = vmatprep.subr.mxu0 %v546_v2 }
 0x12d   : > { %834 = vmatpush2.msra.mxu1 %v543_v3  ;;  %911 = vmatpush2.msra.mxu0 %v545_v4 }
 0x12e   : > { %835 = vmatprep.subr.mxu1 %v536_v5  ;;  %912 = vmatprep.subr.mxu0 %v538_v6 }
 0x12f   : > { %836 = vmatpush2.msra.mxu1 %v535_v7  ;;  %913 = vmatpush2.msra.mxu0 %v537_v8 }
 0x130   : > { %837 = vmatprep.subr.mxu1 %v528_v9  ;;  %914 = vmatprep.subr.mxu0 %v530_v10 }
 0x131   : > { %838 = vmatpush2.msra.mxu1 %v527_v11  ;;  %915 = vmatpush2.msra.mxu0 %v529_v12 }
 0x132   : > { %839 = vmatprep.subr.mxu1 %v520_v13  ;;  %916 = vmatprep.subr.mxu0 %v522_v14 }
 0x133   : > { %840 = vmatpush2.msra.mxu1 %v519_v15  ;;  %917 = vmatpush2.msra.mxu0 %v521_v17 }
 0x134   : > { %841 = vmatprep.subr.mxu1 %v512_v18  ;;  %918 = vmatprep.subr.mxu0 %v514_v19 }
 0x135   : > { %842 = vmatpush2.msra.mxu1 %v511_v20  ;;  %919 = vmatpush2.msra.mxu0 %v513_v21 }
 0x136   : > { %843 = vmatprep.subr.mxu1 %v504_v22  ;;  %920 = vmatprep.subr.mxu0 %v506_v23 }
 0x137   : > { %844 = vmatpush2.msra.mxu1 %v503_v24  ;;  %921 = vmatpush2.msra.mxu0 %v505_v25 }
 0x138   : > { %846 = vmatmul.mubr.f32.vlgmr.msra.gmra.mxu1 %v1641_v16  ;;  %923 = vmatmul.mubr.f32.vlgmr.msra.gmra.mxu0 %v1641_v16 }
 0x139   : > { %851 = vmatprep.mubr.f32.mxu1 %v1645_v26  ;;  %928 = vmatprep.mubr.f32.mxu0 %v1645_v26 }
 0x13a   : > { %947 = vperm.xlu1 %1419, %v944_v27  }
 0x13c   : > { %852 = vmatmul.mubr.f32.gmra.mxu1 %v1647_v29  ;;  %929 = vmatmul.mubr.f32.gmra.mxu0 %v1647_v29  ;;  %v943_v29 = vld [vmem:[%s1721_s4] sm:$0xff] }
 0x13d   : > { %1018 = vmatprep.mubr.f32.mxu1 %v1516_v0  ;;  %1089 = vmatprep.mubr.f32.mxu0 %v1516_v0 }
 0x1b5   : > { %v693_v28 = vpop.f32.mrf.mxu1  ;;  %v770_v30 = vpop.f32.mrf.mxu0 }
 0x1b6   : > { %v935_v26 = vmax.f32 %v693_v28, 0.0  ;;  %v937_v34 = vmax.f32 %v770_v30, 0.0  ;;  %v948_v48 = vpop.permute.xlu1 %947 }
 0x1b7   : > { %v695_v16 = vpop.f32.mrf.mxu1  ;;  %v772_v31 = vpop.f32.mrf.mxu0 }
 0x1b8   : > { %v936_v32 = vmax.f32 %v695_v16, 0.0  ;;  %v938_v33 = vmax.f32 %v772_v31, 0.0 }
 0x1ba   : > { %984 = vmatprep.subr.mxu1 %v936_v32  ;;  %1055 = vmatprep.subr.mxu0 %v938_v33 }
 0x1bb   : > { %985 = vmatpush1.msra.mxu1 %v935_v26  ;;  %1056 = vmatpush1.msra.mxu0 %v937_v34  ;;  %v699_v35 = vpop.f32.mrf.mxu1  ;;  %v776_v36 = vpop.f32.mrf.mxu0 }
 0x1bc   : > { %1353 = vmatmul.mubr.msk.f32.vlgmr.msra.gmra.mxu1 %vm950_vm2, %v943_v29  ;;  %1354 = vmatmul.mubr.msk.f32.vlgmr.msra.gmra.mxu0 %vm950_vm2, %v943_v29 }
 0x1bd   : > { %1160 = vmatprep.mubr.f32.mxu1 %v1516_v0  ;;  %1231 = vmatprep.mubr.f32.mxu0 %v1516_v0  ;;  %v701_v37 = vpop.f32.mrf.mxu1  ;;  %v778_v38 = vpop.f32.mrf.mxu0 }
 0x1f8   : > { %v847_v39 = vpop.f32.mrf.mxu1  ;;  %v924_v40 = vpop.f32.mrf.mxu0 }
 0x1f9   : > { %v939_v45 = vmax.f32 %v847_v39, 0.0  ;;  %v941_v46 = vmax.f32 %v924_v40, 0.0 }
 0x1fa   : > { %v849_v41 = vpop.f32.mrf.mxu1  ;;  %v926_v42 = vpop.f32.mrf.mxu0 }
 0x1fb   : > { %v940_v43 = vmax.f32 %v849_v41, 0.0  ;;  %v942_v44 = vmax.f32 %v926_v42, 0.0 }
 0x1fc   : > { %v853_v0 = vpop.f32.mrf.mxu1  ;;  %v930_v47 = vpop.f32.mrf.mxu0 }
 0x1fd   : > { %1126 = vmatprep.subr.mxu1 %v940_v43  ;;  %1197 = vmatprep.subr.mxu0 %v942_v44 }
 0x1fe   : > { %1127 = vmatpush1.msra.mxu1 %v939_v45  ;;  %1198 = vmatpush1.msra.mxu0 %v941_v46  ;;  %v855_v49 = vpop.f32.mrf.mxu1  ;;  %v932_v50 = vpop.f32.mrf.mxu0 }
 0x1ff   : > { %1355 = vmatmul.mubr.msk.f32.vlgmr.msra.gmra.mxu1 %vm950_vm2, %v943_v29  ;;  %1356 = vmatmul.mubr.msk.f32.vlgmr.msra.gmra.mxu0 %vm950_vm2, %v943_v29 }
 0x27c   : > { %v1020_v51 = vpop.f32.mrf.mxu1  ;;  %v1091_v52 = vpop.f32.mrf.mxu0 }
 0x27d   : > { %v1021_v53 = vadd.f32 %v1020_v51, %v948_v48  ;;  %v1092_v54 = vadd.f32 %v1091_v52, %v948_v48 }
 0x27e   : > { %v1022_v55 = vpop.f32.mrf.mxu1  ;;  %v1093_v56 = vpop.f32.mrf.mxu0 }
 0x27f   : > { %v1238_v57 = vadd.f32 %v1021_v53, %v699_v35  ;;  %v1240_v58 = vadd.f32 %v1092_v54, %v776_v36  ;;  %v1023_v59 = vadd.f32 %v1022_v55, %v948_v48  ;;  %v1094_v60 = vadd.f32 %v1093_v56, %v948_v48 }
 0x281   : > { %1246 = vst [vmem:[%s259_s26] sm:$0xff] %v1238_v57  ;;  %1248 = vst [vmem:[%s259_s26 + $0x10] sm:$0xff] %v1240_v58  ;;  %v1239_v61 = vadd.f32 %v1023_v59, %v701_v37  ;;  %v1241_v62 = vadd.f32 %v1094_v60, %v778_v38 }
 0x283   : > { %1247 = vst [vmem:[%s259_s26 + $0x8] sm:$0xff] %v1239_v61  ;;  %1249 = vst [vmem:[%s259_s26 + $0x18] sm:$0xff] %v1241_v62 }
 0x2bf   : > { %v1162_v63 = vpop.f32.mrf.mxu1  ;;  %v1233_v1 = vpop.f32.mrf.mxu0 }
 0x2c0   : > { %v1163_v2 = vadd.f32 %v1162_v63, %v948_v48  ;;  %v1234_v3 = vadd.f32 %v1233_v1, %v948_v48 }
 0x2c1   : > { %v1164_v4 = vpop.f32.mrf.mxu1  ;;  %v1235_v5 = vpop.f32.mrf.mxu0 }
 0x2c2   : > { %v1242_v6 = vadd.f32 %v1163_v2, %v853_v0  ;;  %v1244_v7 = vadd.f32 %v1234_v3, %v930_v47  ;;  %v1165_v8 = vadd.f32 %v1164_v4, %v948_v48  ;;  %v1236_v9 = vadd.f32 %v1235_v5, %v948_v48 }
 0x2c4   : > { %1250 = vst [vmem:[%s259_s26 + $0x20] sm:$0xff] %v1242_v6  ;;  %1252 = vst [vmem:[%s259_s26 + $0x30] sm:$0xff] %v1244_v7  ;;  %v1243_v10 = vadd.f32 %v1165_v8, %v855_v49  ;;  %v1245_v11 = vadd.f32 %v1236_v9, %v932_v50 }
 0x2c6   : > { %1251 = vst [vmem:[%s259_s26 + $0x28] sm:$0xff] %v1243_v10  ;;  %1253 = vst [vmem:[%s259_s26 + $0x38] sm:$0xff] %v1245_v11 }
 0x2c7   : > { %1460 = shalt.err (!%p1457_p0)
}
 0x2c8   : > { %s1461_s16 = scalar_lea.hbm %s1680_s11, 1024  ;;  %s1465_s19 = scalar_lea.hbm %s1723_s6, 2048 }
 0x2c9   : > { %p1462_p1 = scmp.ne.s32.totalorder %s1680_s11, %s1461_s16  ;;  %p1466_p4 = scmp.lt.s32.totalorder %s1680_s11, %s1723_s6 }
 0x2ca   : > { %p1467_p7 = scmp.lt.s32.totalorder %s1465_s19, %s1461_s16 }
 0x2cb   : > { %p1463_p2 = pnand %p1462_p1, %p1592_p5 }
 0x2cc   : > { %p1468_p8 = por %p1467_p7, %p1466_p4 }
 0x2cd   : > { %p1464_p3 = pneg %p1463_p2 }
 0x2cf   : > { %p1469_p6 = pnand %p1468_p8, %p1464_p3 }
 0x2d1   : > { %1472 = shalt.err (!%p1469_p6)
}
 0x2d2   : > { %1368 = dma.vmem_to_hbm [thread:$0]  (%p1592_p5), %s1270_s29, 1024, %s1680_s11, %s1255_s25  }
 0x2d3 PF: > { %p1380_p9 = scmp.ge.s32.totalorder %s1511_s24, 2  ;;  %s1281_s28 = sand.u32 1, %s1499_s21  }
 0x2d4   : > { %p1727_p10 = scmp.ne.s32.totalorder %s1725_s8, 0  ;;  %s1282_s9 = scalar_lea.sflag [#allocation4], %s1281_s28 }
 0x2d6   : > { %p1375_p11 = pnand %p1380_p9, %p1727_p10 }
 0x2d8   : > { %p1376_p12 = pneg %p1375_p11 }
 0x2da   : > { %1494 = dma.done.wait (%p1376_p12), %s1282_s9, 1024  }
 0x2db   : > { %1496 = vsyncadd (%p1376_p12), %s1282_s9, 4294966272  ;;  %p17_p13 = scmp.ge.s32.totalorder %s1579_s27, 4   ;;  %s1728_s21 = smov %s1503_s22 }
 0x2dc   : > { %s1729_s22 = smov %s1507_s23  ;;  %s1730_s23 = smov %s1590_s30 }
 0x2dd   : > { %s1731_s24 = smov %s1579_s27  ;;  %19 = sbr.rel (!%p17_p13) target bundleno = 4 (0x4), region = 84 }
 0x2e2   :  { %1287 = vsyncpa [#allocation3], 1 }
 0x2e3   :  { %1289 = vsyncpa [#allocation3 + $0x1], 1 }
 0x2e4   :  { %1290 = vsyncpa [#allocation4], 1 }
 0x2e5   :  { %1292 = vsyncpa [#allocation4 + $0x1], 1 }

</bundles_post_ra>
